<compile_context>
chip_gen: v7x
topology: tpu7x:2x2x1
jax: 0.10.0
libtpu: 0.0.40
codegen_flags: <defaults>
</compile_context>

<pallas_src>
import functools

import jax
import jax.numpy as jnp
from jax.experimental import pallas as pl
from jax.experimental.pallas import tpu as pltpu


def _round_up(v, m):
    return ((v + m - 1) // m) * m


def _decoder_kernel(x_ref, w_ref, b_ref, o_ref, *, c_valid):
    # x_ref: (TB, Hp) bf16, w_ref: (Hp, Cp) bf16, b_ref: (1, Cp) f32,
    # o_ref: (TB, Cp) f32.  c_valid = number of real (unpadded) categories.
    x = x_ref[...]
    w = w_ref[...]
    b = b_ref[...]

    # Linear on the MXU (bf16 operands, f32 accumulation) + bias (f32).
    z = jnp.dot(x, w, preferred_element_type=jnp.float32) + b

    # Activation: ReLU (module is constructed with torch.nn.ReLU here).
    a = jnp.maximum(z, 0.0)

    # Mask padded category lanes to -inf so they do not perturb max / exp-sum.
    cp = a.shape[1]
    if c_valid < cp:  # static decision at trace time
        lane = jax.lax.broadcasted_iota(jnp.int32, a.shape, dimension=1)
        a = jnp.where(lane < c_valid, a, -jnp.inf)

    # Numerically-stable log_softmax over the category axis, all in f32.
    m = jnp.max(a, axis=1, keepdims=True)
    s = a - m
    lse = jnp.log(jnp.sum(jnp.exp(s), axis=1, keepdims=True))
    o_ref[...] = (s - lse).astype(o_ref.dtype)


def distribution_decoder(x, weight_t, bias, *, tb=512):
    """x: (B, H) f32, weight_t: (H, C) f32 (PyTorch weight transposed),
    bias: (1, C) f32  ->  (B, C) f32 log-probs."""
    B, H = x.shape
    H2, C = weight_t.shape
    assert H == H2 and bias.shape == (1, C)
    # squeeze() semantics of the reference module only match for B > 1.
    assert B >= 2, "DistributionDecoder kernel requires batch >= 2 (squeeze semantics)"

    # Lane-dense padding: H, C -> multiple of 128 (zero-pad is exact for the
    # matmul; padded C lanes are -inf-masked in-kernel).
    Hp = _round_up(H, 128)
    Cp = _round_up(C, 128)

    # Batch tile: up to `tb` rows, rounded to 16 (bf16 sublane packing).
    TB = min(tb, _round_up(B, 16))
    Bp = _round_up(B, TB)

    x_p = jnp.zeros((Bp, Hp), jnp.bfloat16).at[:B, :H].set(x.astype(jnp.bfloat16))
    w_p = jnp.zeros((Hp, Cp), jnp.bfloat16).at[:H, :C].set(weight_t.astype(jnp.bfloat16))
    b_p = jnp.zeros((1, Cp), jnp.float32).at[:, :C].set(bias.astype(jnp.float32))

    kernel = functools.partial(_decoder_kernel, c_valid=C)

    out = pl.pallas_call(
        kernel,
        out_shape=jax.ShapeDtypeStruct((Bp, Cp), jnp.float32),
        grid=(Bp // TB,),
        in_specs=[
            pl.BlockSpec((TB, Hp), lambda i: (i, 0)),   # x: streamed per batch tile
            pl.BlockSpec((Hp, Cp), lambda i: (0, 0)),   # weight: VMEM-resident
            pl.BlockSpec((1, Cp), lambda i: (0, 0)),    # bias: VMEM-resident
        ],
        out_specs=pl.BlockSpec((TB, Cp), lambda i: (i, 0)),
        compiler_params=pltpu.CompilerParams(
            dimension_semantics=("parallel",),
        ),
    )(x_p, w_p, b_p)

    return out[:B, :C]


def reference(x, weight_t, bias):
    z = x @ weight_t + bias
    a = jnp.maximum(z, 0.0)
    return jax.nn.log_softmax(a.squeeze(), axis=1)


if __name__ == "__main__":
    # Small shapes implied by the forward: x is (batch, input_size),
    # output is (batch, num_categories).
    batch = 8
    input_size = 32
    num_categories = 16  # len(field.categories)

    key = jax.random.PRNGKey(0)
    kx, kw, kb = jax.random.split(key, 3)

    x = jax.random.normal(kx, (batch, input_size), dtype=jnp.float32)
    # PyTorch Linear weight is (out, in); we store its transpose (in, out).
    weight_t = jax.random.normal(kw, (input_size, num_categories), dtype=jnp.float32) * 0.1
    bias = jax.random.normal(kb, (1, num_categories), dtype=jnp.float32) * 0.1

    out = distribution_decoder(x, weight_t, bias)
    out = jax.block_until_ready(out)

    ref = reference(x, weight_t, bias)
    assert out.shape == (batch, num_categories)
    # bf16 matmul operands -> relaxed tolerance vs the f32 reference.
    assert jnp.allclose(out, ref, atol=3e-2, rtol=2e-2), "mismatch vs reference"

    print("KERNEL_OK")
</pallas_src>

<mosaic_0001>
module attributes {stable_mosaic.version = 11 : i64} {
  func.func @_decoder_kernel(%arg0: i32, %arg1: memref<16x128xbf16, #tpu.memory_space<vmem>>, %arg2: memref<128x128xbf16, #tpu.memory_space<vmem>>, %arg3: memref<1x128xf32, #tpu.memory_space<vmem>>, %arg4: memref<16x128xf32, #tpu.memory_space<vmem>>) attributes {dimension_semantics = [#tpu.dimension_semantics<parallel>], iteration_bounds = array<i64: 1>, scalar_prefetch = 0 : i64, scratch_operands = 0 : i64, tpu.core_type = #tpu.core_type<tc>, window_params = [{transform_indices = @transform_0, window_bounds = array<i64: 16, 128>}, {pipeline_mode = #tpu.pipeline_mode<synchronous>, transform_indices = @transform_1, window_bounds = array<i64: 128, 128>}, {pipeline_mode = #tpu.pipeline_mode<synchronous>, transform_indices = @transform_2, window_bounds = array<i64: 1, 128>}, {transform_indices = @transform_3, window_bounds = array<i64: 16, 128>}]} {
    %c0 = arith.constant 0 : index
    %c0_0 = arith.constant 0 : index
    %0 = vector.load %arg1[%c0, %c0_0] : memref<16x128xbf16, #tpu.memory_space<vmem>>, vector<16x128xbf16>
    %c0_1 = arith.constant 0 : index
    %c0_2 = arith.constant 0 : index
    %1 = vector.load %arg2[%c0_1, %c0_2] : memref<128x128xbf16, #tpu.memory_space<vmem>>, vector<128x128xbf16>
    %c0_3 = arith.constant 0 : index
    %c0_4 = arith.constant 0 : index
    %2 = vector.load %arg3[%c0_3, %c0_4] : memref<1x128xf32, #tpu.memory_space<vmem>>, vector<1x128xf32>
    %cst = arith.constant dense<0.000000e+00> : vector<16x128xf32>
    %3 = tpu.matmul %0, %1, %cst {dimension_numbers = #tpu.dot_dimension_numbers<[1], [0], [0], [1], [0, 0, 1, 1], [], []>} : vector<16x128xbf16>, vector<128x128xbf16>, vector<16x128xf32> -> vector<16x128xf32>
    %4 = vector.broadcast %2 : vector<1x128xf32> to vector<16x128xf32>
    %5 = arith.addf %3, %4 : vector<16x128xf32>
    %cst_5 = arith.constant 0.000000e+00 : f32
    %6 = vector.broadcast %cst_5 : f32 to vector<16x128xf32>
    %7 = arith.maximumf %5, %6 : vector<16x128xf32>
    %8 = tpu.iota {dimensions = array<i32: 1>} : vector<16x128xi32>
    %c16_i32 = arith.constant 16 : i32
    %9 = vector.broadcast %c16_i32 : i32 to vector<16x128xi32>
    %10 = arith.cmpi slt, %8, %9 : vector<16x128xi32>
    %cst_6 = arith.constant 0xFF800000 : f32
    %11 = vector.broadcast %cst_6 : f32 to vector<16x128xf32>
    %12 = arith.select %10, %7, %11 : vector<16x128xi1>, vector<16x128xf32>
    %cst_7 = arith.constant dense<0xFF800000> : vector<16xf32>
    %13 = vector.multi_reduction <maximumf>, %12, %cst_7 [1] : vector<16x128xf32> to vector<16xf32>
    %14 = vector.shape_cast %13 : vector<16xf32> to vector<16x1xf32>
    %15 = vector.broadcast %14 : vector<16x1xf32> to vector<16x128xf32>
    %16 = arith.subf %12, %15 : vector<16x128xf32>
    %17 = math.exp %16 : vector<16x128xf32>
    %cst_8 = arith.constant dense<0.000000e+00> : vector<16xf32>
    %18 = vector.multi_reduction <add>, %17, %cst_8 [1] : vector<16x128xf32> to vector<16xf32>
    %19 = vector.shape_cast %18 : vector<16xf32> to vector<16x1xf32>
    %20 = math.log %19 : vector<16x1xf32>
    %21 = vector.broadcast %20 : vector<16x1xf32> to vector<16x128xf32>
    %22 = arith.subf %16, %21 : vector<16x128xf32>
    %c0_9 = arith.constant 0 : index
    %c0_10 = arith.constant 0 : index
    %23 = vector.load %arg4[%c0_9, %c0_10] : memref<16x128xf32, #tpu.memory_space<vmem>>, vector<16x128xf32>
    tpu.vector_store %arg4[%c0_9, %c0_10], %22 {strides = array<i32>} : memref<16x128xf32, #tpu.memory_space<vmem>>, vector<16x128xf32>,
    return
  }
  func.func @transform_0(%arg0: i32) -> (i32, i32) {
    %c0_i32 = arith.constant 0 : i32
    %c0_i32_0 = arith.constant 0 : i32
    return %arg0, %c0_i32 : i32, i32
  }
  func.func @transform_1(%arg0: i32) -> (i32, i32) {
    %c0_i32 = arith.constant 0 : i32
    %c0_i32_0 = arith.constant 0 : i32
    %c0_i32_1 = arith.constant 0 : i32
    return %c0_i32, %c0_i32_0 : i32, i32
  }
  func.func @transform_2(%arg0: i32) -> (i32, i32) {
    %c0_i32 = arith.constant 0 : i32
    %c0_i32_0 = arith.constant 0 : i32
    %c0_i32_1 = arith.constant 0 : i32
    return %c0_i32, %c0_i32_0 : i32, i32
  }
  func.func @transform_3(%arg0: i32) -> (i32, i32) {
    %c0_i32 = arith.constant 0 : i32
    %c0_i32_0 = arith.constant 0 : i32
    return %arg0, %c0_i32 : i32, i32
  }
}

</mosaic_0001>

<bundles_post_ra>
// kernel: tpu_custom_call.1
= control target key start
LH: loop header
LB: loop body
LE: loop exit
PB: predicated region body
PF: predicated region fallthrough
CT: control target
= control target key end

     0   :  { %8 = vsyncpa [#allocation3], 0  ;;  %s416_s0 = inlined_call_operand.hbm [shape: bf16[16,128], index: 0, kind: input, shape index: {}]   ;;  %s417_s1 = inlined_call_operand.hbm [shape: bf16[128,128], index: 1, kind: input, shape index: {}]   ;;  %s418_s2 = inlined_call_operand.vmem [shape: f32[1,128], index: 2, kind: input, shape index: {}]   ;;  %s419_s3 = inlined_call_operand.hbm [shape: f32[16,128], index: 3, kind: output, shape index: {}]  }
   0x1   :  { %9 = vsyncpa [#allocation6], 0 }
   0x2   :  { %10 = vsyncpa [#allocation4], 0  ;;  %s348_s12 = smov [#allocation2]   ;;  %s276_s16 = scalar_lea.hbm %s416_s0, 128 }
   0x3   :  { %s16_s13 = sshll.u32 %s348_s12, 4  ;;  %p277_p0 = scmp.ne.s32.totalorder %s416_s0, %s276_s16  ;;  %s17_s13 = int_to_ptr.vmem [resolvable:$true] %s16_s13 }
   0x4   :  { %p280_p1 = scmp.lt.u32.totalorder %s276_s16, %s416_s0 }
   0x6   :  { %p282_p2 = pnand %p280_p1, %p277_p0 }
   0x8   :  { %285 = shalt.err (!%p282_p2)
}
   0x9   :  { %s286_s21 = scalar_lea.vmem %s17_s13, 128  ;;  %p291_p4 = scmp.lt.s32.totalorder %s17_s13, %s17_s13 }
   0xa   :  { %p287_p3 = scmp.ne.s32.totalorder %s17_s13, %s286_s21  ;;  %p292_p5 = scmp.lt.s32.totalorder %s286_s21, %s286_s21 }
   0xc   :  { %p293_p6 = por %p292_p5, %p291_p4 }
   0xe   :  { %p294_p7 = pnand %p293_p6, %p287_p3 }
  0x10   :  { %297 = shalt.err (!%p294_p7)
}
  0x11   :  { %s349_s22 = smov 64   ;;  %s350_s23 = smov 4  }
  0x12   :  { %22 = dma.hbm_to_vmem [thread:$0]  %s416_s0, 128, %s17_s13, [#allocation3], %s349_s22, %s349_s22, %s350_s23  }
  0x13   :  { %s351_s26 = smov [#allocation5]   ;;  %s298_s30 = scalar_lea.hbm %s417_s1, 1024 }
  0x14   :  { %s28_s27 = sshll.u32 %s351_s26, 4  ;;  %p299_p8 = scmp.ne.s32.totalorder %s417_s1, %s298_s30  ;;  %s29_s27 = int_to_ptr.vmem [resolvable:$true] %s28_s27 }
  0x15   :  { %p302_p9 = scmp.lt.u32.totalorder %s298_s30, %s417_s1 }
  0x17   :  { %p304_p10 = pnand %p302_p9, %p299_p8 }
  0x19   :  { %307 = shalt.err (!%p304_p10)
}
  0x1a   :  { %s308_s8 = scalar_lea.vmem %s29_s27, 1024  ;;  %p313_p12 = scmp.lt.s32.totalorder %s29_s27, %s29_s27 }
  0x1b   :  { %p309_p11 = scmp.ne.s32.totalorder %s29_s27, %s308_s8  ;;  %p314_p13 = scmp.lt.s32.totalorder %s308_s8, %s308_s8 }
  0x1d   :  { %p315_p0 = por %p314_p13, %p313_p12 }
  0x1f   :  { %p316_p1 = pnand %p315_p0, %p309_p11 }
  0x21   :  { %319 = shalt.err (!%p316_p1)
}
  0x22   :  { %34 = dma.hbm_to_vmem [thread:$0]  %s417_s1, 1024, %s29_s27, [#allocation6], %s349_s22, %s349_s22, %s350_s23  }
  0x23   :  { %342 = dma.done.wait [#allocation3], 128  }
  0x24   :  { %343 = vsyncadd [#allocation3], 4294967168 }
  0x25   :  { %344 = dma.done.wait [#allocation6], 1024  }
  0x26   :  { %345 = vsyncadd [#allocation6], 4294966272  ;;  %v352_v0 = vmov 0.0   ;;  %vm353_vm0 = vmmov 0   ;;  %v259_v1 = vld [vmem:[#allocation5] sm:$0xff]   ;;  %v260_v2 = vld [vmem:[#allocation5 + $0x8] sm:$0xff]   ;;  %v166_v10 = vlaneseq }
  0x27   :  { %230 = vmatprep.subr.bf16.mxu0 %v352_v0  ;;  %246 = vmatprep.mubr.msk.bf16.mxu0 %vm353_vm0, %v352_v0  ;;  %v261_v3 = vld [vmem:[#allocation5 + $0x10] sm:$0xff]   ;;  %v262_v4 = vld [vmem:[#allocation5 + $0x18] sm:$0xff]   ;;  %v263_v5 = vld [vmem:[#allocation5 + $0x20] sm:$0xff]  }
  0x28   :  { %231 = vmatpush3.bf16.msra.mxu0 %v259_v1  ;;  %v264_v6 = vld [vmem:[#allocation5 + $0x28] sm:$0xff]   ;;  %v265_v7 = vld [vmem:[#allocation5 + $0x30] sm:$0xff]   ;;  %v266_v8 = vld [vmem:[#allocation5 + $0x38] sm:$0xff]   ;;  %v167_v12 = vand.u32 127, %v166_v10 }
  0x29   :  { %232 = vmatprep.subr.bf16.mxu0 %v352_v0  ;;  %v267_v9 = vld [vmem:[#allocation2] sm:$0xff]  }
  0x2a   :  { %v211_v11 = vld [vmem:[%s418_s2] ss:$0 sm:$0xff]  ;;  %vm168_vm1 = vcmp.lt.s32.totalorder %v167_v12, 16  ;;  %s354_s2 = smov [#allocation7]  }
  0x2b   :  { %s198_s11 = sshll.u32 %s354_s2, 4  ;;  %s199_s11 = int_to_ptr.vmem [resolvable:$true] %s198_s11 }
  0x2c   :  { %233 = vmatpush3.bf16.msra.mxu0 %v260_v2  ;;  %s320_s12 = scalar_lea.vmem %s199_s11, 256  ;;  %p325_p3 = scmp.lt.s32.totalorder %s199_s11, %s199_s11 }
  0x2d   :  { %234 = vmatprep.subr.bf16.mxu0 %v352_v0  ;;  %p321_p2 = scmp.ne.s32.totalorder %s199_s11, %s320_s12  ;;  %p326_p4 = scmp.lt.s32.totalorder %s320_s12, %s320_s12 }
  0x2f   :  { %p327_p5 = por %p326_p4, %p325_p3 }
  0x30   :  { %235 = vmatpush3.bf16.msra.mxu0 %v261_v3 }
  0x31   :  { %236 = vmatprep.subr.bf16.mxu0 %v352_v0  ;;  %p328_p6 = pnand %p327_p5, %p321_p2 }
  0x34   :  { %237 = vmatpush3.bf16.msra.mxu0 %v262_v4 }
  0x35   :  { %238 = vmatprep.subr.bf16.mxu0 %v352_v0 }
  0x38   :  { %239 = vmatpush3.bf16.msra.mxu0 %v263_v5 }
  0x39   :  { %240 = vmatprep.subr.bf16.mxu0 %v352_v0 }
  0x3c   :  { %241 = vmatpush3.bf16.msra.mxu0 %v264_v6 }
  0x3d   :  { %242 = vmatprep.subr.bf16.mxu0 %v352_v0 }
  0x40   :  { %243 = vmatpush3.bf16.msra.mxu0 %v265_v7 }
  0x41   :  { %244 = vmatprep.subr.bf16.mxu0 %v352_v0 }
  0x44   :  { %245 = vmatpush3.bf16.msra.mxu0 %v266_v8 }
  0x47   :  { %247 = vmatmul.mubr.bf16.vlgmr.msra.gmra.mrb[0].mxu0 %v267_v9 }
 0x11a   :  { %v157_v13 = vpop.f32.mrb[0].mxu0 }
 0x11b   :  { %v158_v14 = vadd.f32 %v211_v11, %v157_v13  ;;  %v248_v15 = vpop.f32.mrb[1].mxu0 }
 0x11c   :  { %v160_v16 = vpop.f32.mrb[2].mxu0 }
 0x11d   :  { %v164_v17 = vmax.f32 %v158_v14, 0.0  ;;  %v161_v18 = vadd.f32 %v211_v11, %v160_v16  ;;  %v249_v19 = vpop.f32.mrb[3].mxu0 }
 0x11f   :  { %v165_v20 = vmax.f32 %v161_v18, 0.0  ;;  %v169_v21 = vsel %vm168_vm1, %v164_v17, -inf }
 0x120   :  { %171 = vmax.xlane.f32.xlu0 %v169_v21 }
 0x121   :  { %v170_v22 = vsel %vm168_vm1, %v165_v20, -inf }
 0x124   :  { %173 = vmax.xlane.f32.xlu0 %v170_v22 }
 0x1ad   :  { %v172_v23 = vpop.xlane.xlu0 %171 }
 0x1ae   :  { %v175_v24 = vsub.f32 %v169_v21, %v172_v23 }
 0x1b0   :  { %v177_v25 = vmul.f32 1.442695, %v175_v24 }
 0x1b1   :  { %v174_v26 = vpop.xlane.xlu0 %173 }
 0x1b2   :  { %v176_v27 = vsub.f32 %v170_v22, %v174_v26  ;;  %268 = vpow2.f32 %v177_v25 }
 0x1b4   :  { %v179_v28 = vmul.f32 1.442695, %v176_v27 }
 0x1b6   :  { %270 = vpow2.f32 %v179_v28 }
 0x1bc   :  { %v269_v29 = vpop.eup %268 }
 0x1bd   :  { %181 = vadd.xlane.f32.xlu1 %v269_v29 }
 0x1c0   :  { %v271_v30 = vpop.eup %270 }
 0x1c1   :  { %183 = vadd.xlane.f32.xlu1 %v271_v30 }
 0x24a   :  { %v182_v31 = vpop.xlane.xlu1 %181 }
 0x24b   :  { %272 = vlog2.f32 %v182_v31 }
 0x24e   :  { %v184_v32 = vpop.xlane.xlu1 %183 }
 0x24f   :  { %274 = vlog2.f32 %v184_v32 }
 0x255   :  { %v273_v33 = vpop.eup %272 }
 0x256   :  { %v186_v34 = vmul.f32 0.6931472, %v273_v33 }
 0x258   :  { %v189_v35 = vsub.f32 %v175_v24, %v186_v34 }
 0x259   :  { %v275_v36 = vpop.eup %274 }
 0x25a   :  { %191 = vst [vmem:[#allocation7] sm:$0xff] %v189_v35  ;;  %v188_v37 = vmul.f32 0.6931472, %v275_v36 }
 0x25c   :  { %v190_v38 = vsub.f32 %v176_v27, %v188_v37 }
 0x25e   :  { %192 = vst [vmem:[#allocation7 + $0x8] sm:$0xff] %v190_v38 }
 0x25f   :  { %331 = shalt.err (!%p328_p6)
}
 0x260   :  { %s332_s15 = scalar_lea.hbm %s419_s3, 256 }
 0x261   :  { %p333_p7 = scmp.ne.s32.totalorder %s419_s3, %s332_s15  ;;  %p336_p8 = scmp.lt.u32.totalorder %s332_s15, %s419_s3 }
 0x263   :  { %p338_p9 = pnand %p336_p8, %p333_p7 }
 0x265   :  { %341 = shalt.err (!%p338_p9)
}
 0x266   :  { %s355_s20 = smov 128   ;;  %s356_s21 = smov 8  }
 0x267   :  { %204 = dma.vmem_to_hbm [thread:$0]  %s199_s11, 256, %s419_s3, [#allocation4], %s355_s20, %s355_s20, %s356_s21  }
 0x268   :  { %346 = dma.done.wait [#allocation4], 256  }
 0x269   :  { %347 = vsyncadd [#allocation4], 4294967040 }
 0x26a   :  { %208 = vsyncpa [#allocation3], 1 }
 0x26b   :  { %209 = vsyncpa [#allocation6], 1 }
 0x26c   :  { %210 = vsyncpa [#allocation4], 1 }

</bundles_post_ra>
